<compile_context>
chip_gen: v7x
topology: tpu7x:2x2x1
jax: 0.10.0
libtpu: 0.0.40
codegen_flags: <defaults>
</compile_context>

<pallas_src>
import jax
import jax.numpy as jnp
from jax.experimental import pallas as pl
from jax.experimental.pallas import tpu as pltpu

EPS = 1e-5
_DEFAULT_CHUNK = 1024  # batch rows streamed per grid step (multiple of 128)


def _round_up(n, m):
    return ((n + m - 1) // m) * m


def _fold_params(params):
    """Fold each BatchNorm's affine (gamma/beta) into the Linear that follows.

    PyTorch layout: w (out, in), b (out,), gamma/beta (out,).
    Using  W @ (n*g + be) + b == (W*g) @ n + (W @ be + b).
    Returns kernel params: biases as (out, 1) columns, w4 as a (1, 16) row.
    """
    (w1, b1, g1, be1, w2, b2, g2, be2, w3, b3, g3, be3, w4, b4) = params
    w2f = w2 * g1[None, :]
    b2f = b2 + w2 @ be1
    w3f = w3 * g2[None, :]
    b3f = b3 + w3 @ be2
    w4f = w4 * g3[None, :]
    b4f = b4 + w4 @ be3
    col = lambda v: v.reshape(-1, 1)
    return (w1, col(b1), w2f, col(b2f), w3f, col(b3f), w4f, b4f.reshape(1, 1))


def _make_kernel(B, Bp, TB):
    inv_b = 1.0 / float(B)
    padded = Bp > B

    def kernel(x_ref,
               w1_ref, b1_ref, w2_ref, b2_ref, w3_ref, b3_ref, w4_ref, b4_ref,
               o_ref, h1_ref, sum1_ref):
        i = pl.program_id(0)
        nc = pl.num_programs(0)

        @pl.when(i == 0)
        def _init():
            sum1_ref[...] = jnp.zeros_like(sum1_ref)

        # ---- Layer 1 on this (TB, 17) chunk, consumed in its native layout.
        # (64, 17) x (TB, 17) contracting both "in" dims -> (64, TB); no host-
        # or kernel-side transpose of x is materialized.
        z1 = jax.lax.dot_general(
            w1_ref[...], x_ref[...],
            dimension_numbers=(((1,), (1,)), ((), ())),
            preferred_element_type=jnp.float32) + b1_ref[...]
        h1 = jnp.tanh(z1)                                   # (64, TB)
        if padded:
            lane = jax.lax.broadcasted_iota(jnp.int32, (1, TB), 1)
            h1 = jnp.where(i * TB + lane < B, h1, 0.0)      # zero padded columns
        off = pl.multiple_of(i * TB, TB)
        h1_ref[:, pl.ds(off, TB)] = h1
        # Streaming BN1 mean accumulation (variance done two-pass at finalize).
        sum1_ref[...] += jnp.sum(h1, axis=1, keepdims=True)

        # ---- Finalize: BN1..BN3 folded into layers 2..4 on the resident h1.
        @pl.when(i == nc - 1)
        def _finalize():
            if padded:
                lane_f = jax.lax.broadcasted_iota(jnp.int32, (1, Bp), 1)
                colmask = lane_f < B
            else:
                colmask = None

            def bn_stats(h, mu=None):
                # Full-batch training-mode BatchNorm1d stats, two-pass variance
                # (E[(h-mu)^2], biased / divide-by-B, like PyTorch).
                if mu is None:
                    hm = jnp.where(colmask, h, 0.0) if padded else h
                    mu = jnp.sum(hm, axis=1, keepdims=True) * inv_b
                d = h - mu
                if padded:
                    d = jnp.where(colmask, d, 0.0)
                var = jnp.sum(d * d, axis=1, keepdims=True) * inv_b
                return mu, jax.lax.rsqrt(var + EPS)

            def scale_cols(w, s):
                # w * s^T without a sublane->lane relayout of the tiny (F,1)
                # scale vector: multiply by diag(s) on the (mostly idle) MXU.
                f = s.shape[0]
                r = jax.lax.broadcasted_iota(jnp.int32, (f, f), 0)
                c = jax.lax.broadcasted_iota(jnp.int32, (f, f), 1)
                diag = jnp.where(r == c, s, jnp.float32(0.0))
                return jnp.dot(w, diag, preferred_element_type=jnp.float32)

            def fold(w_ref, b_ref, mu, s):
                # W @ ((h-mu)*s) + b == We @ h + (b - We @ mu),  We = W*s^T
                we = scale_cols(w_ref[...], s)
                be = b_ref[...] - jnp.dot(we, mu, preferred_element_type=jnp.float32)
                return we, be

            h1a = h1_ref[...]                               # (64, Bp)
            mu1, s1 = bn_stats(h1a, mu=sum1_ref[...] * inv_b)

            w2e, b2e = fold(w2_ref, b2_ref, mu1, s1)
            h2 = jnp.tanh(jnp.dot(w2e, h1a, preferred_element_type=jnp.float32) + b2e)
            mu2, s2 = bn_stats(h2)                          # (32, Bp)

            w3e, b3e = fold(w3_ref, b3_ref, mu2, s2)
            h3 = jnp.tanh(jnp.dot(w3e, h2, preferred_element_type=jnp.float32) + b3e)
            mu3, s3 = bn_stats(h3)                          # (16, Bp)

            w4e, b4e = fold(w4_ref, b4_ref, mu3, s3)
            # Final 16 -> 1 layer on the MXU: (1,16) @ (16,Bp) -> lane-dense (1,Bp).
            o_ref[...] = jnp.dot(w4e, h3, preferred_element_type=jnp.float32) + b4e

    return kernel


def _vmem_capacity_bytes():
    try:
        return int(pltpu.get_tpu_info().vmem_capacity_bytes)
    except Exception:
        return 64 << 20  # conservative (v7x-sized) fallback


def _full_spec(arr):
    return pl.BlockSpec(arr.shape, lambda i: (0, 0))


@jax.jit
def neural_network4_forward(x, params):
    """x: (B, 17) float32; params in PyTorch layout. Returns (B,) float32."""
    B = x.shape[0]
    TB = min(_DEFAULT_CHUNK, _round_up(B, 128))
    Bp = _round_up(B, TB)
    nc = Bp // TB

    kparams = _fold_params(params)          # gamma/beta folded into next Linear
    xp = x if Bp == B else jnp.pad(x, ((0, Bp - B), (0, 0)))

    # Per-generation VMEM budget with headroom for pipeline/internal scratch.
    cap = int(_vmem_capacity_bytes() * 0.85)
    resident = 4 * Bp * (64 + 32 + 16 + 1)  # h1 scratch + h2 + h3 + out (f32)
    if resident > cap:
        raise ValueError(
            f"Batch {B} needs ~{resident >> 20} MiB of resident activations for "
            f"full-batch BatchNorm; only ~{cap >> 20} MiB of VMEM is available "
            f"on this TPU generation.")
    vmem_limit = int(min(max(2 * resident + (4 << 20), 8 << 20), cap))

    kernel = _make_kernel(B, Bp, TB)
    grid_spec = pltpu.PrefetchScalarGridSpec(
        num_scalar_prefetch=0,
        grid=(nc,),
        in_specs=[pl.BlockSpec((TB, 17), lambda i: (i, 0))]
                 + [_full_spec(p) for p in kparams],
        out_specs=pl.BlockSpec((1, Bp), lambda i: (0, 0)),
        scratch_shapes=[pltpu.VMEM((64, Bp), jnp.float32),   # resident h1
                        pltpu.VMEM((64, 1), jnp.float32)],   # BN1 sum accumulator
    )
    out = pl.pallas_call(
        kernel,
        out_shape=jax.ShapeDtypeStruct((1, Bp), jnp.float32),
        grid_spec=grid_spec,
        compiler_params=pltpu.CompilerParams(
            dimension_semantics=("arbitrary",),
            vmem_limit_bytes=vmem_limit),
    )(xp, *kparams)
    return out[0, :B]


def init_params(key):
    """Deterministic synthetic parameters in PyTorch layout.

    Linear: w (out, in), b (out,) ~ U(-1/sqrt(in), 1/sqrt(in)).
    BatchNorm1d (fresh module): gamma = ones, beta = zeros.
    """
    dims = [(17, 64), (64, 32), (32, 16), (16, 1)]
    keys = jax.random.split(key, 2 * len(dims))
    flat = []
    for i, (din, dout) in enumerate(dims):
        bound = 1.0 / (din ** 0.5)
        w = jax.random.uniform(keys[2 * i], (dout, din), jnp.float32, -bound, bound)
        b = jax.random.uniform(keys[2 * i + 1], (dout,), jnp.float32, -bound, bound)
        flat.append(w)
        flat.append(b)
        if i < 3:  # BatchNorm1d after the first three Linear+Tanh blocks
            flat.append(jnp.ones((dout,), jnp.float32))   # gamma
            flat.append(jnp.zeros((dout,), jnp.float32))  # beta
    return tuple(flat)


def _reference(x, params):
    """Plain-JAX replica of the PyTorch forward (training-mode BatchNorm)."""
    (w1, b1, g1, be1, w2, b2, g2, be2, w3, b3, g3, be3, w4, b4) = params

    def bn(h, g, be):
        mu = h.mean(axis=0, keepdims=True)
        var = ((h - mu) ** 2).mean(axis=0, keepdims=True)
        return (h - mu) / jnp.sqrt(var + EPS) * g + be

    h = jnp.tanh(x @ w1.T + b1); h = bn(h, g1, be1)
    h = jnp.tanh(h @ w2.T + b2); h = bn(h, g2, be2)
    h = jnp.tanh(h @ w3.T + b3); h = bn(h, g3, be3)
    h = h @ w4.T + b4
    return h[:, 0]


if __name__ == "__main__":
    key = jax.random.PRNGKey(0)
    kx, kp = jax.random.split(key)
    B = 8
    x = jax.random.normal(kx, (B, 17), jnp.float32)
    params = init_params(kp)

    out = neural_network4_forward(x, params)
    jax.block_until_ready(out)

    ref = _reference(x, params)
    assert out.shape == (B,)
    assert jnp.allclose(out, ref, atol=1e-5, rtol=1e-5), (out, ref)
    print("KERNEL_OK")
</pallas_src>

<mosaic_0001>
module attributes {stable_mosaic.version = 11 : i64} {
  func.func @kernel(%arg0: i32, %arg1: memref<128x17xf32, #tpu.memory_space<vmem>>, %arg2: memref<64x17xf32, #tpu.memory_space<vmem>>, %arg3: memref<64x1xf32, #tpu.memory_space<vmem>>, %arg4: memref<32x64xf32, #tpu.memory_space<vmem>>, %arg5: memref<32x1xf32, #tpu.memory_space<vmem>>, %arg6: memref<16x32xf32, #tpu.memory_space<vmem>>, %arg7: memref<16x1xf32, #tpu.memory_space<vmem>>, %arg8: memref<1x16xf32, #tpu.memory_space<vmem>>, %arg9: memref<1x1xf32, #tpu.memory_space<vmem>>, %arg10: memref<1x128xf32, #tpu.memory_space<vmem>>, %arg11: memref<64x128xf32, #tpu.memory_space<vmem>>, %arg12: memref<64x1xf32, #tpu.memory_space<vmem>>) attributes {dimension_semantics = [#tpu.dimension_semantics<arbitrary>], iteration_bounds = array<i64: 1>, scalar_prefetch = 0 : i64, scratch_operands = 2 : i64, tpu.core_type = #tpu.core_type<tc>, window_params = [{transform_indices = @transform_0, window_bounds = array<i64: 128, 17>}, {pipeline_mode = #tpu.pipeline_mode<synchronous>, transform_indices = @transform_1, window_bounds = array<i64: 64, 17>}, {pipeline_mode = #tpu.pipeline_mode<synchronous>, transform_indices = @transform_2, window_bounds = array<i64: 64, 1>}, {pipeline_mode = #tpu.pipeline_mode<synchronous>, transform_indices = @transform_3, window_bounds = array<i64: 32, 64>}, {pipeline_mode = #tpu.pipeline_mode<synchronous>, transform_indices = @transform_4, window_bounds = array<i64: 32, 1>}, {pipeline_mode = #tpu.pipeline_mode<synchronous>, transform_indices = @transform_5, window_bounds = array<i64: 16, 32>}, {pipeline_mode = #tpu.pipeline_mode<synchronous>, transform_indices = @transform_6, window_bounds = array<i64: 16, 1>}, {pipeline_mode = #tpu.pipeline_mode<synchronous>, transform_indices = @transform_7, window_bounds = array<i64: 1, 16>}, {pipeline_mode = #tpu.pipeline_mode<synchronous>, transform_indices = @transform_8, window_bounds = array<i64: 1, 1>}, {pipeline_mode = #tpu.pipeline_mode<synchronous>, transform_indices = @transform_9, window_bounds = array<i64: 1, 128>}]} {
    %c0_i32 = arith.constant 0 : i32
    %0 = arith.cmpi eq, %arg0, %c0_i32 : i32
    %1 = arith.extui %0 : i1 to i32
    %c0_i32_0 = arith.constant 0 : i32
    %2 = arith.cmpi ne, %1, %c0_i32_0 : i32
    scf.if %2 {
      %cst_16 = arith.constant 0.000000e+00 : f32
      %32 = vector.broadcast %cst_16 : f32 to vector<64x1xf32>
      %c0_17 = arith.constant 0 : index
      %c0_18 = arith.constant 0 : index
      %33 = vector.load %arg12[%c0_17, %c0_18] : memref<64x1xf32, #tpu.memory_space<vmem>>, vector<64x1xf32>
      tpu.vector_store %arg12[%c0_17, %c0_18], %32 {strides = array<i32>} : memref<64x1xf32, #tpu.memory_space<vmem>>, vector<64x1xf32>,
    } else {
    }
    %c0 = arith.constant 0 : index
    %c0_1 = arith.constant 0 : index
    %3 = vector.load %arg2[%c0, %c0_1] : memref<64x17xf32, #tpu.memory_space<vmem>>, vector<64x17xf32>
    %c0_2 = arith.constant 0 : index
    %c0_3 = arith.constant 0 : index
    %4 = vector.load %arg1[%c0_2, %c0_3] : memref<128x17xf32, #tpu.memory_space<vmem>>, vector<128x17xf32>
    %cst = arith.constant dense<0.000000e+00> : vector<64x128xf32>
    %5 = tpu.matmul %3, %4, %cst {dimension_numbers = #tpu.dot_dimension_numbers<[1], [1], [0], [0], [0, 0, 1, 0], [], []>} : vector<64x17xf32>, vector<128x17xf32>, vector<64x128xf32> -> vector<64x128xf32>
    %c0_4 = arith.constant 0 : index
    %c0_5 = arith.constant 0 : index
    %6 = vector.load %arg3[%c0_4, %c0_5] : memref<64x1xf32, #tpu.memory_space<vmem>>, vector<64x1xf32>
    %7 = vector.broadcast %6 : vector<64x1xf32> to vector<64x128xf32>
    %8 = arith.addf %5, %7 : vector<64x128xf32>
    %9 = math.tanh %8 : vector<64x128xf32>
    %10 = tpu.iota {dimensions = array<i32: 1>} : vector<1x128xi32>
    %c128_i32 = arith.constant 128 : i32
    %11 = arith.muli %arg0, %c128_i32 : i32
    %12 = vector.broadcast %11 : i32 to vector<1x128xi32>
    %13 = arith.addi %12, %10 : vector<1x128xi32>
    %c8_i32 = arith.constant 8 : i32
    %14 = vector.broadcast %c8_i32 : i32 to vector<1x128xi32>
    %15 = arith.cmpi slt, %13, %14 : vector<1x128xi32>
    %cst_6 = arith.constant 0.000000e+00 : f32
    %16 = vector.shape_cast %15 : vector<1x128xi1> to vector<1x128xi1>
    %17 = vector.broadcast %16 : vector<1x128xi1> to vector<64x128xi1>
    %18 = vector.broadcast %cst_6 : f32 to vector<64x128xf32>
    %19 = arith.select %17, %9, %18 : vector<64x128xi1>, vector<64x128xf32>
    %c128_i32_7 = arith.constant 128 : i32
    %20 = arith.muli %arg0, %c128_i32_7 : i32
    %21 = tpu.assume_multiple %20, 128 : i32
    %c0_8 = arith.constant 0 : index
    %22 = arith.index_cast %21 : i32 to index
    %23 = vector.load %arg11[%c0_8, %22] : memref<64x128xf32, #tpu.memory_space<vmem>>, vector<64x128xf32>
    tpu.vector_store %arg11[%c0_8, %22], %19 {strides = array<i32>} : memref<64x128xf32, #tpu.memory_space<vmem>>, vector<64x128xf32>,
    %c0_9 = arith.constant 0 : index
    %c0_10 = arith.constant 0 : index
    %24 = vector.load %arg12[%c0_9, %c0_10] : memref<64x1xf32, #tpu.memory_space<vmem>>, vector<64x1xf32>
    %cst_11 = arith.constant dense<0.000000e+00> : vector<64xf32>
    %25 = vector.multi_reduction <add>, %19, %cst_11 [1] : vector<64x128xf32> to vector<64xf32>
    %26 = vector.shape_cast %25 : vector<64xf32> to vector<64x1xf32>
    %27 = arith.addf %24, %26 : vector<64x1xf32>
    %c0_12 = arith.constant 0 : index
    %c0_13 = arith.constant 0 : index
    %28 = vector.load %arg12[%c0_12, %c0_13] : memref<64x1xf32, #tpu.memory_space<vmem>>, vector<64x1xf32>
    tpu.vector_store %arg12[%c0_12, %c0_13], %27 {strides = array<i32>} : memref<64x1xf32, #tpu.memory_space<vmem>>, vector<64x1xf32>,
    %c0_i32_14 = arith.constant 0 : i32
    %29 = arith.cmpi eq, %arg0, %c0_i32_14 : i32
    %30 = arith.extui %29 : i1 to i32
    %c0_i32_15 = arith.constant 0 : i32
    %31 = arith.cmpi ne, %30, %c0_i32_15 : i32
    scf.if %31 {
      %32 = tpu.iota {dimensions = array<i32: 1>} : vector<1x128xi32>
      %c8_i32_16 = arith.constant 8 : i32
      %33 = vector.broadcast %c8_i32_16 : i32 to vector<1x128xi32>
      %34 = arith.cmpi slt, %32, %33 : vector<1x128xi32>
      %c0_17 = arith.constant 0 : index
      %c0_18 = arith.constant 0 : index
      %35 = vector.load %arg11[%c0_17, %c0_18] : memref<64x128xf32, #tpu.memory_space<vmem>>, vector<64x128xf32>
      %c0_19 = arith.constant 0 : index
      %c0_20 = arith.constant 0 : index
      %36 = vector.load %arg12[%c0_19, %c0_20] : memref<64x1xf32, #tpu.memory_space<vmem>>, vector<64x1xf32>
      %cst_21 = arith.constant 1.250000e-01 : f32
      %37 = vector.broadcast %cst_21 : f32 to vector<64x1xf32>
      %38 = arith.mulf %36, %37 : vector<64x1xf32>
      %39 = vector.broadcast %38 : vector<64x1xf32> to vector<64x128xf32>
      %40 = arith.subf %35, %39 : vector<64x128xf32>
      %cst_22 = arith.constant 0.000000e+00 : f32
      %41 = vector.shape_cast %34 : vector<1x128xi1> to vector<1x128xi1>
      %42 = vector.broadcast %41 : vector<1x128xi1> to vector<64x128xi1>
      %43 = vector.broadcast %cst_22 : f32 to vector<64x128xf32>
      %44 = arith.select %42, %40, %43 : vector<64x128xi1>, vector<64x128xf32>
      %45 = arith.mulf %44, %44 : vector<64x128xf32>
      %cst_23 = arith.constant dense<0.000000e+00> : vector<64xf32>
      %46 = vector.multi_reduction <add>, %45, %cst_23 [1] : vector<64x128xf32> to vector<64xf32>
      %47 = vector.shape_cast %46 : vector<64xf32> to vector<64x1xf32>
      %cst_24 = arith.constant 1.250000e-01 : f32
      %48 = vector.broadcast %cst_24 : f32 to vector<64x1xf32>
      %49 = arith.mulf %47, %48 : vector<64x1xf32>
      %cst_25 = arith.constant 9.99999974E-6 : f32
      %50 = vector.broadcast %cst_25 : f32 to vector<64x1xf32>
      %51 = arith.addf %49, %50 : vector<64x1xf32>
      %52 = math.rsqrt %51 : vector<64x1xf32>
      %c0_26 = arith.constant 0 : index
      %c0_27 = arith.constant 0 : index
      %53 = vector.load %arg4[%c0_26, %c0_27] : memref<32x64xf32, #tpu.memory_space<vmem>>, vector<32x64xf32>
      %54 = tpu.iota {dimensions = array<i32: 0>} : vector<64x64xi32>
      %55 = tpu.iota {dimensions = array<i32: 1>} : vector<64x64xi32>
      %56 = arith.cmpi eq, %54, %55 : vector<64x64xi32>
      %cst_28 = arith.constant 0.000000e+00 : f32
      %57 = vector.shape_cast %52 : vector<64x1xf32> to vector<64x1xf32>
      %58 = vector.broadcast %57 : vector<64x1xf32> to vector<64x64xf32>
      %59 = vector.broadcast %cst_28 : f32 to vector<64x64xf32>
      %60 = arith.select %56, %58, %59 : vector<64x64xi1>, vector<64x64xf32>
      %cst_29 = arith.constant dense<0.000000e+00> : vector<32x64xf32>
      %61 = tpu.matmul %53, %60, %cst_29 {dimension_numbers = #tpu.dot_dimension_numbers<[1], [0], [0], [1], [0, 0, 1, 1], [], []>} : vector<32x64xf32>, vector<64x64xf32>, vector<32x64xf32> -> vector<32x64xf32>
      %c0_30 = arith.constant 0 : index
      %c0_31 = arith.constant 0 : index
      %62 = vector.load %arg5[%c0_30, %c0_31] : memref<32x1xf32, #tpu.memory_space<vmem>>, vector<32x1xf32>
      %cst_32 = arith.constant dense<0.000000e+00> : vector<32x1xf32>
      %63 = tpu.matmul %61, %38, %cst_32 {dimension_numbers = #tpu.dot_dimension_numbers<[1], [0], [0], [1], [0, 0, 1, 1], [], []>} : vector<32x64xf32>, vector<64x1xf32>, vector<32x1xf32> -> vector<32x1xf32>
      %64 = arith.subf %62, %63 : vector<32x1xf32>
      %cst_33 = arith.constant dense<0.000000e+00> : vector<32x128xf32>
      %65 = tpu.matmul %61, %35, %cst_33 {dimension_numbers = #tpu.dot_dimension_numbers<[1], [0], [0], [1], [0, 0, 1, 1], [], []>} : vector<32x64xf32>, vector<64x128xf32>, vector<32x128xf32> -> vector<32x128xf32>
      %66 = vector.broadcast %64 : vector<32x1xf32> to vector<32x128xf32>
      %67 = arith.addf %65, %66 : vector<32x128xf32>
      %68 = math.tanh %67 : vector<32x128xf32>
      %cst_34 = arith.constant 0.000000e+00 : f32
      %69 = vector.shape_cast %34 : vector<1x128xi1> to vector<1x128xi1>
      %70 = vector.broadcast %69 : vector<1x128xi1> to vector<32x128xi1>
      %71 = vector.broadcast %cst_34 : f32 to vector<32x128xf32>
      %72 = arith.select %70, %68, %71 : vector<32x128xi1>, vector<32x128xf32>
      %cst_35 = arith.constant dense<0.000000e+00> : vector<32xf32>
      %73 = vector.multi_reduction <add>, %72, %cst_35 [1] : vector<32x128xf32> to vector<32xf32>
      %74 = vector.shape_cast %73 : vector<32xf32> to vector<32x1xf32>
      %cst_36 = arith.constant 1.250000e-01 : f32
      %75 = vector.broadcast %cst_36 : f32 to vector<32x1xf32>
      %76 = arith.mulf %74, %75 : vector<32x1xf32>
      %77 = vector.broadcast %76 : vector<32x1xf32> to vector<32x128xf32>
      %78 = arith.subf %68, %77 : vector<32x128xf32>
      %cst_37 = arith.constant 0.000000e+00 : f32
      %79 = vector.shape_cast %34 : vector<1x128xi1> to vector<1x128xi1>
      %80 = vector.broadcast %79 : vector<1x128xi1> to vector<32x128xi1>
      %81 = vector.broadcast %cst_37 : f32 to vector<32x128xf32>
      %82 = arith.select %80, %78, %81 : vector<32x128xi1>, vector<32x128xf32>
      %83 = arith.mulf %82, %82 : vector<32x128xf32>
      %cst_38 = arith.constant dense<0.000000e+00> : vector<32xf32>
      %84 = vector.multi_reduction <add>, %83, %cst_38 [1] : vector<32x128xf32> to vector<32xf32>
      %85 = vector.shape_cast %84 : vector<32xf32> to vector<32x1xf32>
      %cst_39 = arith.constant 1.250000e-01 : f32
      %86 = vector.broadcast %cst_39 : f32 to vector<32x1xf32>
      %87 = arith.mulf %85, %86 : vector<32x1xf32>
      %cst_40 = arith.constant 9.99999974E-6 : f32
      %88 = vector.broadcast %cst_40 : f32 to vector<32x1xf32>
      %89 = arith.addf %87, %88 : vector<32x1xf32>
      %90 = math.rsqrt %89 : vector<32x1xf32>
      %c0_41 = arith.constant 0 : index
      %c0_42 = arith.constant 0 : index
      %91 = vector.load %arg6[%c0_41, %c0_42] : memref<16x32xf32, #tpu.memory_space<vmem>>, vector<16x32xf32>
      %92 = tpu.iota {dimensions = array<i32: 0>} : vector<32x32xi32>
      %93 = tpu.iota {dimensions = array<i32: 1>} : vector<32x32xi32>
      %94 = arith.cmpi eq, %92, %93 : vector<32x32xi32>
      %cst_43 = arith.constant 0.000000e+00 : f32
      %95 = vector.shape_cast %90 : vector<32x1xf32> to vector<32x1xf32>
      %96 = vector.broadcast %95 : vector<32x1xf32> to vector<32x32xf32>
      %97 = vector.broadcast %cst_43 : f32 to vector<32x32xf32>
      %98 = arith.select %94, %96, %97 : vector<32x32xi1>, vector<32x32xf32>
      %cst_44 = arith.constant dense<0.000000e+00> : vector<16x32xf32>
      %99 = tpu.matmul %91, %98, %cst_44 {dimension_numbers = #tpu.dot_dimension_numbers<[1], [0], [0], [1], [0, 0, 1, 1], [], []>} : vector<16x32xf32>, vector<32x32xf32>, vector<16x32xf32> -> vector<16x32xf32>
      %c0_45 = arith.constant 0 : index
      %c0_46 = arith.constant 0 : index
      %100 = vector.load %arg7[%c0_45, %c0_46] : memref<16x1xf32, #tpu.memory_space<vmem>>, vector<16x1xf32>
      %cst_47 = arith.constant dense<0.000000e+00> : vector<16x1xf32>
      %101 = tpu.matmul %99, %76, %cst_47 {dimension_numbers = #tpu.dot_dimension_numbers<[1], [0], [0], [1], [0, 0, 1, 1], [], []>} : vector<16x32xf32>, vector<32x1xf32>, vector<16x1xf32> -> vector<16x1xf32>
      %102 = arith.subf %100, %101 : vector<16x1xf32>
      %cst_48 = arith.constant dense<0.000000e+00> : vector<16x128xf32>
      %103 = tpu.matmul %99, %68, %cst_48 {dimension_numbers = #tpu.dot_dimension_numbers<[1], [0], [0], [1], [0, 0, 1, 1], [], []>} : vector<16x32xf32>, vector<32x128xf32>, vector<16x128xf32> -> vector<16x128xf32>
      %104 = vector.broadcast %102 : vector<16x1xf32> to vector<16x128xf32>
      %105 = arith.addf %103, %104 : vector<16x128xf32>
      %106 = math.tanh %105 : vector<16x128xf32>
      %cst_49 = arith.constant 0.000000e+00 : f32
      %107 = vector.shape_cast %34 : vector<1x128xi1> to vector<1x128xi1>
      %108 = vector.broadcast %107 : vector<1x128xi1> to vector<16x128xi1>
      %109 = vector.broadcast %cst_49 : f32 to vector<16x128xf32>
      %110 = arith.select %108, %106, %109 : vector<16x128xi1>, vector<16x128xf32>
      %cst_50 = arith.constant dense<0.000000e+00> : vector<16xf32>
      %111 = vector.multi_reduction <add>, %110, %cst_50 [1] : vector<16x128xf32> to vector<16xf32>
      %112 = vector.shape_cast %111 : vector<16xf32> to vector<16x1xf32>
      %cst_51 = arith.constant 1.250000e-01 : f32
      %113 = vector.broadcast %cst_51 : f32 to vector<16x1xf32>
      %114 = arith.mulf %112, %113 : vector<16x1xf32>
      %115 = vector.broadcast %114 : vector<16x1xf32> to vector<16x128xf32>
      %116 = arith.subf %106, %115 : vector<16x128xf32>
      %cst_52 = arith.constant 0.000000e+00 : f32
      %117 = vector.shape_cast %34 : vector<1x128xi1> to vector<1x128xi1>
      %118 = vector.broadcast %117 : vector<1x128xi1> to vector<16x128xi1>
      %119 = vector.broadcast %cst_52 : f32 to vector<16x128xf32>
      %120 = arith.select %118, %116, %119 : vector<16x128xi1>, vector<16x128xf32>
      %121 = arith.mulf %120, %120 : vector<16x128xf32>
      %cst_53 = arith.constant dense<0.000000e+00> : vector<16xf32>
      %122 = vector.multi_reduction <add>, %121, %cst_53 [1] : vector<16x128xf32> to vector<16xf32>
      %123 = vector.shape_cast %122 : vector<16xf32> to vector<16x1xf32>
      %cst_54 = arith.constant 1.250000e-01 : f32
      %124 = vector.broadcast %cst_54 : f32 to vector<16x1xf32>
      %125 = arith.mulf %123, %124 : vector<16x1xf32>
      %cst_55 = arith.constant 9.99999974E-6 : f32
      %126 = vector.broadcast %cst_55 : f32 to vector<16x1xf32>
      %127 = arith.addf %125, %126 : vector<16x1xf32>
      %128 = math.rsqrt %127 : vector<16x1xf32>
      %c0_56 = arith.constant 0 : index
      %c0_57 = arith.constant 0 : index
      %129 = vector.load %arg8[%c0_56, %c0_57] : memref<1x16xf32, #tpu.memory_space<vmem>>, vector<1x16xf32>
      %130 = tpu.iota {dimensions = array<i32: 0>} : vector<16x16xi32>
      %131 = tpu.iota {dimensions = array<i32: 1>} : vector<16x16xi32>
      %132 = arith.cmpi eq, %130, %131 : vector<16x16xi32>
      %cst_58 = arith.constant 0.000000e+00 : f32
      %133 = vector.shape_cast %128 : vector<16x1xf32> to vector<16x1xf32>
      %134 = vector.broadcast %133 : vector<16x1xf32> to vector<16x16xf32>
      %135 = vector.broadcast %cst_58 : f32 to vector<16x16xf32>
      %136 = arith.select %132, %134, %135 : vector<16x16xi1>, vector<16x16xf32>
      %cst_59 = arith.constant dense<0.000000e+00> : vector<1x16xf32>
      %137 = tpu.matmul %129, %136, %cst_59 {dimension_numbers = #tpu.dot_dimension_numbers<[1], [0], [0], [1], [0, 0, 1, 1], [], []>} : vector<1x16xf32>, vector<16x16xf32>, vector<1x16xf32> -> vector<1x16xf32>
      %c0_60 = arith.constant 0 : index
      %c0_61 = arith.constant 0 : index
      %138 = vector.load %arg9[%c0_60, %c0_61] : memref<1x1xf32, #tpu.memory_space<vmem>>, vector<1x1xf32>
      %cst_62 = arith.constant dense<0.000000e+00> : vector<1x1xf32>
      %139 = tpu.matmul %137, %114, %cst_62 {dimension_numbers = #tpu.dot_dimension_numbers<[1], [0], [0], [1], [0, 0, 1, 1], [], []>} : vector<1x16xf32>, vector<16x1xf32>, vector<1x1xf32> -> vector<1x1xf32>
      %140 = arith.subf %138, %139 : vector<1x1xf32>
      %cst_63 = arith.constant dense<0.000000e+00> : vector<1x128xf32>
      %141 = tpu.matmul %137, %106, %cst_63 {dimension_numbers = #tpu.dot_dimension_numbers<[1], [0], [0], [1], [0, 0, 1, 1], [], []>} : vector<1x16xf32>, vector<16x128xf32>, vector<1x128xf32> -> vector<1x128xf32>
      %142 = vector.broadcast %140 : vector<1x1xf32> to vector<1x128xf32>
      %143 = arith.addf %141, %142 : vector<1x128xf32>
      %c0_64 = arith.constant 0 : index
      %c0_65 = arith.constant 0 : index
      %144 = vector.load %arg10[%c0_64, %c0_65] : memref<1x128xf32, #tpu.memory_space<vmem>>, vector<1x128xf32>
      tpu.vector_store %arg10[%c0_64, %c0_65], %143 {strides = array<i32>} : memref<1x128xf32, #tpu.memory_space<vmem>>, vector<1x128xf32>,
    } else {
    }
    return
  }
  func.func @transform_0(%arg0: i32) -> (i32, i32) {
    %c0_i32 = arith.constant 0 : i32
    %c0_i32_0 = arith.constant 0 : i32
    return %arg0, %c0_i32 : i32, i32
  }
  func.func @transform_1(%arg0: i32) -> (i32, i32) {
    %c0_i32 = arith.constant 0 : i32
    %c0_i32_0 = arith.constant 0 : i32
    %c0_i32_1 = arith.constant 0 : i32
    return %c0_i32, %c0_i32_0 : i32, i32
  }
  func.func @transform_2(%arg0: i32) -> (i32, i32) {
    %c0_i32 = arith.constant 0 : i32
    %c0_i32_0 = arith.constant 0 : i32
    %c0_i32_1 = arith.constant 0 : i32
    return %c0_i32, %c0_i32_0 : i32, i32
  }
  func.func @transform_3(%arg0: i32) -> (i32, i32) {
    %c0_i32 = arith.constant 0 : i32
    %c0_i32_0 = arith.constant 0 : i32
    %c0_i32_1 = arith.constant 0 : i32
    return %c0_i32, %c0_i32_0 : i32, i32
  }
  func.func @transform_4(%arg0: i32) -> (i32, i32) {
    %c0_i32 = arith.constant 0 : i32
    %c0_i32_0 = arith.constant 0 : i32
    %c0_i32_1 = arith.constant 0 : i32
    return %c0_i32, %c0_i32_0 : i32, i32
  }
  func.func @transform_5(%arg0: i32) -> (i32, i32) {
    %c0_i32 = arith.constant 0 : i32
    %c0_i32_0 = arith.constant 0 : i32
    %c0_i32_1 = arith.constant 0 : i32
    return %c0_i32, %c0_i32_0 : i32, i32
  }
  func.func @transform_6(%arg0: i32) -> (i32, i32) {
    %c0_i32 = arith.constant 0 : i32
    %c0_i32_0 = arith.constant 0 : i32
    %c0_i32_1 = arith.constant 0 : i32
    return %c0_i32, %c0_i32_0 : i32, i32
  }
  func.func @transform_7(%arg0: i32) -> (i32, i32) {
    %c0_i32 = arith.constant 0 : i32
    %c0_i32_0 = arith.constant 0 : i32
    %c0_i32_1 = arith.constant 0 : i32
    return %c0_i32, %c0_i32_0 : i32, i32
  }
  func.func @transform_8(%arg0: i32) -> (i32, i32) {
    %c0_i32 = arith.constant 0 : i32
    %c0_i32_0 = arith.constant 0 : i32
    %c0_i32_1 = arith.constant 0 : i32
    return %c0_i32, %c0_i32_0 : i32, i32
  }
  func.func @transform_9(%arg0: i32) -> (i32, i32) {
    %c0_i32 = arith.constant 0 : i32
    %c0_i32_0 = arith.constant 0 : i32
    %c0_i32_1 = arith.constant 0 : i32
    return %c0_i32, %c0_i32_0 : i32, i32
  }
}

</mosaic_0001>

<bundles_post_ra>
// kernel: neural_network4_forward.1
= control target key start
LH: loop header
LB: loop body
LE: loop exit
PB: predicated region body
PF: predicated region fallthrough
CT: control target
= control target key end

     0   :  { %vm119_vm0 = vcmask 138240   ;;  %v1947_v3 = vmov 0   ;;  %vm38_vm2 = vcmask 7168   ;;  %v1948_v42 = vmov 0.0   ;;  %s2449_s0 = inlined_call_operand.vmem [shape: f32[128,17], index: 0, kind: input, shape index: {}]   ;;  %s2450_s1 = inlined_call_operand.vmem [shape: f32[64,17], index: 1, kind: input, shape index: {}]   ;;  %s2451_s2 = inlined_call_operand.vmem [shape: f32[64,1], index: 2, kind: input, shape index: {}]   ;;  %s2452_s3 = inlined_call_operand.vmem [shape: f32[32,64], index: 3, kind: input, shape index: {}]   ;;  %s2453_s4 = inlined_call_operand.vmem [shape: f32[32,1], index: 4, kind: input, shape index: {}]   ;;  %s2454_s5 = inlined_call_operand.vmem [shape: f32[16,32], index: 5, kind: input, shape index: {}]   ;;  %s2455_s6 = inlined_call_operand.vmem [shape: f32[16,1], index: 6, kind: input, shape index: {}]   ;;  %s2456_s7 = inlined_call_operand.vmem [shape: f32[1,16], index: 7, kind: input, shape index: {}]   ;;  %s2457_s8 = inlined_call_operand.<no memory space> [shape: f32[1,1], index: 8, kind: input, shape index: {}]   ;;  %s2458_s9 = inlined_call_operand.vmem [shape: f32[1,128], index: 9, kind: output, shape index: {}]  }
   0x1   :  { %v55_v0 = vld [vmem:[%s2449_s0] sm:$0xff]  ;;  %v56_v1 = vld [vmem:[%s2449_s0 + $0x8] sm:$0xff]  ;;  %vm2009_vm1 = vmpackc.low %vm119_vm0, %vm119_vm0  ;;  %1890 = vset.pattern.permute.xlu1 %v1947_v3  ;;  %1889 = vset.pattern.permute.xlu0 %v1947_v3  ;;  %40 = vst.msk [vmem:[#allocation3 + $0x8] sm:$0xff] %vm38_vm2, %v1948_v42  ;;  %v305_v51 = vlaneseq  ;;  %vm536_vm4 = vcmask 523264  }
   0x2   :  { %v1735_v4 = vpack.c.bf16 %v56_v1, %v55_v0  ;;  %v57_v5 = vld [vmem:[%s2449_s0 + $0x10] sm:$0xff]  ;;  %v58_v6 = vld [vmem:[%s2449_s0 + $0x18] sm:$0xff]  ;;  %v47_v8 = vld [vmem:[%s2450_s1] sm:$0xff]  ;;  %39 = vst.msk [vmem:[#allocation3] sm:$0xff] %vm38_vm2, %v1948_v42 }
   0x3   :  { %v1741_v7 = vpack.c.bf16 %v58_v6, %v57_v5  ;;  %v59_v9 = vld [vmem:[%s2449_s0 + $0x20] sm:$0xff]  ;;  %v60_v10 = vld [vmem:[%s2449_s0 + $0x28] sm:$0xff]  ;;  %1603 = vmatprep.mubr.msk.f32.mxu0 %vm119_vm0, %v47_v8  ;;  %v73_v11 = vld [vmem:[%s2451_s2 + $0x10] sm:$0xff]  ;;  %41 = vst.msk [vmem:[#allocation3 + $0x10] sm:$0xff] %vm38_vm2, %v1948_v42  ;;  %v2160_v58 = vand.u32 127, %v305_v51 }
   0x4   :  { %1737 = vmatprep.subr.msk.bf16.mxu0 %vm2009_vm1, %v1735_v4  ;;  %v71_v12 = vld [vmem:[%s2451_s2] sm:$0xff]  ;;  %v1747_v13 = vpack.c.bf16 %v60_v10, %v59_v9  ;;  %91 = vperm.xlu1 %1890, %v73_v11   ;;  %v74_v14 = vld [vmem:[%s2451_s2 + $0x18] sm:$0xff]  ;;  %v72_v15 = vld [vmem:[%s2451_s2 + $0x8] sm:$0xff]  ;;  %42 = vst.msk [vmem:[#allocation3 + $0x18] sm:$0xff] %vm38_vm2, %v1948_v42 }
   0x5   :  { %1740 = vmatpush3.bf16.xpose.msk.msra.mxu0 %vm2009_vm1, %v1735_v4  ;;  %81 = vperm.xlu0 %1889, %v71_v12   ;;  %v61_v16 = vld [vmem:[%s2449_s0 + $0x30] sm:$0xff]  ;;  %v62_v17 = vld [vmem:[%s2449_s0 + $0x38] sm:$0xff]  ;;  %v76_v18 = vld [vmem:[%s2451_s2 + $0x28] sm:$0xff]  ;;  %43 = vst.msk [vmem:[#allocation3 + $0x20] sm:$0xff] %vm38_vm2, %v1948_v42  ;;  %vm310_vm3 = vcmp.lt.s32.totalorder %v2160_v58, 8 }
   0x6   :  { %1743 = vmatprep.subr.msk.bf16.mxu0 %vm2009_vm1, %v1741_v7  ;;  %v75_v19 = vld [vmem:[%s2451_s2 + $0x20] sm:$0xff]  ;;  %v1753_v20 = vpack.c.bf16 %v62_v17, %v61_v16  ;;  %v78_v21 = vld [vmem:[%s2451_s2 + $0x38] sm:$0xff]  ;;  %v77_v22 = vld [vmem:[%s2451_s2 + $0x30] sm:$0xff]  ;;  %44 = vst.msk [vmem:[#allocation3 + $0x28] sm:$0xff] %vm38_vm2, %v1948_v42 }
   0x7   :  { %v63_v23 = vld [vmem:[%s2449_s0 + $0x40] sm:$0xff]  ;;  %v64_v24 = vld [vmem:[%s2449_s0 + $0x48] sm:$0xff]  ;;  %v65_v26 = vld [vmem:[%s2449_s0 + $0x50] sm:$0xff]  ;;  %45 = vst.msk [vmem:[#allocation3 + $0x30] sm:$0xff] %vm38_vm2, %v1948_v42 }
   0x8   :  { %96 = vperm.xlu1 %1890, %v74_v14   ;;  %v1759_v25 = vpack.c.bf16 %v64_v24, %v63_v23  ;;  %v66_v27 = vld [vmem:[%s2449_s0 + $0x58] sm:$0xff]  ;;  %v67_v29 = vld [vmem:[%s2449_s0 + $0x60] sm:$0xff]  ;;  %v68_v30 = vld [vmem:[%s2449_s0 + $0x68] sm:$0xff]  ;;  %46 = vst.msk [vmem:[#allocation3 + $0x38] sm:$0xff] %vm38_vm2, %v1948_v42 }
   0x9   :  { %86 = vperm.xlu0 %1889, %v72_v15   ;;  %v1765_v28 = vpack.c.bf16 %v66_v27, %v65_v26  ;;  %v1771_v31 = vpack.c.bf16 %v68_v30, %v67_v29  ;;  %v69_v32 = vld [vmem:[%s2449_s0 + $0x70] sm:$0xff]  ;;  %v70_v33 = vld [vmem:[%s2449_s0 + $0x78] sm:$0xff]  ;;  %v48_v35 = vld [vmem:[%s2450_s1 + $0x8] sm:$0xff] }
   0xa   :  { %v1777_v34 = vpack.c.bf16 %v70_v33, %v69_v32  ;;  %v49_v36 = vld [vmem:[%s2450_s1 + $0x10] sm:$0xff]  ;;  %v50_v37 = vld [vmem:[%s2450_s1 + $0x18] sm:$0xff]  ;;  %v51_v38 = vld [vmem:[%s2450_s1 + $0x20] sm:$0xff] }
   0xb   :  { %v52_v39 = vld [vmem:[%s2450_s1 + $0x28] sm:$0xff]  ;;  %v53_v40 = vld [vmem:[%s2450_s1 + $0x30] sm:$0xff]  ;;  %v54_v41 = vld [vmem:[%s2450_s1 + $0x38] sm:$0xff] }
   0xc   :  { %106 = vperm.xlu1 %1890, %v76_v18   ;;  %v332_v26 = vld [vmem:[#allocation3] sm:$0xff] }
   0xd   :  { %1746 = vmatpush3.bf16.xpose.msk.msra.mxu0 %vm2009_vm1, %v1741_v7  ;;  %101 = vperm.xlu0 %1889, %v75_v19  }
   0xe   :  { %1749 = vmatprep.subr.msk.bf16.mxu0 %vm2009_vm1, %v1747_v13 }
  0x10   :  { %116 = vperm.xlu1 %1890, %v78_v21  }
  0x11   :  { %111 = vperm.xlu0 %1889, %v77_v22  }
  0x15   :  { %1752 = vmatpush3.bf16.xpose.msk.msra.mxu0 %vm2009_vm1, %v1747_v13 }
  0x16   :  { %1755 = vmatprep.subr.msk.bf16.mxu0 %vm2009_vm1, %v1753_v20 }
  0x1d   :  { %1758 = vmatpush3.bf16.xpose.msk.msra.mxu0 %vm2009_vm1, %v1753_v20 }
  0x1e   :  { %1761 = vmatprep.subr.msk.bf16.mxu0 %vm2009_vm1, %v1759_v25 }
  0x25   :  { %1764 = vmatpush3.bf16.xpose.msk.msra.mxu0 %vm2009_vm1, %v1759_v25  ;;  %v333_v25 = vld [vmem:[#allocation3 + $0x8] sm:$0xff] }
  0x26   :  { %1767 = vmatprep.subr.msk.bf16.mxu0 %vm2009_vm1, %v1765_v28 }
  0x2d   :  { %1770 = vmatpush3.bf16.xpose.msk.msra.mxu0 %vm2009_vm1, %v1765_v28 }
  0x2e   :  { %1773 = vmatprep.subr.msk.bf16.mxu0 %vm2009_vm1, %v1771_v31 }
  0x35   :  { %1776 = vmatpush3.bf16.xpose.msk.msra.mxu0 %vm2009_vm1, %v1771_v31  ;;  %v335_v31 = vld [vmem:[#allocation3 + $0x18] sm:$0xff] }
  0x36   :  { %1779 = vmatprep.subr.msk.bf16.mxu0 %vm2009_vm1, %v1777_v34 }
  0x3d   :  { %1782 = vmatpush3.bf16.xpose.msk.msra.mxu0 %vm2009_vm1, %v1777_v34  ;;  %v336_v34 = vld [vmem:[#allocation3 + $0x20] sm:$0xff]  ;;  %vm2312_vm1 = vmpackc.low %vm310_vm3, %vm310_vm3 }
  0x44   :  { %1604 = vmatmul.mubr.msk.f32.vlgmr.msra.gmra.mrb[0].mxu0 %vm119_vm0, %v48_v35  ;;  %v334_v35 = vld [vmem:[#allocation3 + $0x10] sm:$0xff] }
  0x45   :  { %1606 = vmatprep.mubr.msk.f32.mxu0 %vm119_vm0, %v49_v36 }
  0x48   :  { %1607 = vmatmul.mubr.msk.f32.gmra.mrb[2].mxu0 %vm119_vm0, %v50_v37 }
  0x49   :  { %1609 = vmatprep.mubr.msk.f32.mxu0 %vm119_vm0, %v51_v38 }
  0x4c   :  { %1610 = vmatmul.mubr.msk.f32.gmra.mrb[4].mxu0 %vm119_vm0, %v52_v39 }
  0x4d   :  { %1612 = vmatprep.mubr.msk.f32.mxu0 %vm119_vm0, %v53_v40 }
  0x50   :  { %1613 = vmatmul.mubr.msk.f32.gmra.mrb[6].mxu0 %vm119_vm0, %v54_v41  ;;  %v338_v41 = vld [vmem:[#allocation3 + $0x30] sm:$0xff] }
  0x83   :  { %v92_v43 = vpop.permute.xlu1 %91 }
  0x84   :  { %v82_v44 = vpop.permute.xlu0 %81 }
  0x87   :  { %v97_v45 = vpop.permute.xlu1 %96 }
  0x88   :  { %v87_v46 = vpop.permute.xlu0 %86 }
  0x8b   :  { %v107_v55 = vpop.permute.xlu1 %106 }
  0x8c   :  { %v102_v57 = vpop.permute.xlu0 %101 }
  0x8f   :  { %v117_v63 = vpop.permute.xlu1 %116 }
  0x90   :  { %v112_v2 = vpop.permute.xlu0 %111 }
 0x117   :  { %v1605_v47 = vpop.f32.mrb[0].mxu0 }
 0x118   :  { %v264_v48 = vadd.f32 %v1605_v47, %v87_v46  ;;  %v258_v49 = vpop.f32.mrb[1].mxu0 }
 0x119   :  { %v259_v50 = vadd.f32 %v258_v49, %v82_v44  ;;  %v337_v44 = vld [vmem:[#allocation3 + $0x28] sm:$0xff] }
 0x11a   :  { %1891 = vtanh.f32 %v264_v48 }
 0x11b   :  { %1893 = vtanh.f32 %v259_v50  ;;  %v1608_v52 = vpop.f32.mrb[2].mxu0 }
 0x11c   :  { %v274_v53 = vadd.f32 %v1608_v52, %v97_v45  ;;  %v268_v54 = vpop.f32.mrb[3].mxu0 }
 0x11d   :  { %v269_v56 = vadd.f32 %v268_v54, %v92_v43 }
 0x11e   :  { %1895 = vtanh.f32 %v274_v53  ;;  %v339_v53 = vld [vmem:[#allocation3 + $0x38] sm:$0xff] }
 0x11f   :  { %1897 = vtanh.f32 %v269_v56  ;;  %v1611_v59 = vpop.f32.mrb[4].mxu0 }
 0x120   :  { %v284_v60 = vadd.f32 %v1611_v59, %v107_v55  ;;  %v278_v61 = vpop.f32.mrb[5].mxu0 }
 0x121   :  { %v279_v62 = vadd.f32 %v278_v61, %v102_v57 }
 0x122   :  { %1899 = vtanh.f32 %v284_v60 }
 0x123   :  { %1901 = vtanh.f32 %v279_v62  ;;  %v1614_v0 = vpop.f32.mrb[6].mxu0 }
 0x124   :  { %v1892_v1 = vpop.eup %1891  ;;  %v294_v3 = vadd.f32 %v1614_v0, %v117_v63  ;;  %v288_v4 = vpop.f32.mrb[7].mxu0 }
 0x125   :  { %v1894_v5 = vpop.eup %1893  ;;  %v289_v6 = vadd.f32 %v288_v4, %v112_v2  ;;  %v2165_v7 = vsel %vm310_vm3, %v1892_v1, 0.0 }
 0x126   :  { %1903 = vtanh.f32 %v294_v3  ;;  %342 = vadd.xlane.f32.xlu1 %v2165_v7  ;;  %v2170_v8 = vsel %vm310_vm3, %v1894_v5, 0.0  ;;  %v2172_v9 = vpack.c.bf16 %v1892_v1, %v1894_v5 }
 0x127   :  { %1905 = vtanh.f32 %v289_v6  ;;  %340 = vadd.xlane.f32.xlu0 %v2170_v8 }
 0x128   :  { %v1896_v10 = vpop.eup %1895 }
 0x129   :  { %v1898_v11 = vpop.eup %1897  ;;  %v2177_v12 = vsel %vm310_vm3, %v1896_v10, 0.0 }
 0x12a   :  { %v2179_v13 = vpack.c.bf16 %v1896_v10, %v1898_v11  ;;  %v2188_v17 = vsel %vm310_vm3, %v1898_v11, 0.0 }
 0x12b   :  { %346 = vadd.xlane.f32.xlu0 %v2177_v12 }
 0x12c   :  { %v1900_v14 = vpop.eup %1899 }
 0x12d   :  { %v1902_v15 = vpop.eup %1901  ;;  %v2200_v22 = vsel %vm310_vm3, %v1900_v14, 0.0 }
 0x12e   :  { %v2184_v16 = vsel %vm310_vm3, %v1902_v15, 0.0  ;;  %v2190_v18 = vpack.c.bf16 %v1900_v14, %v1902_v15 }
 0x12f   :  { %348 = vadd.xlane.f32.xlu1 %v2184_v16  ;;  %344 = vadd.xlane.f32.xlu0 %v2188_v17 }
 0x130   :  { %v1904_v19 = vpop.eup %1903 }
 0x131   :  { %v1906_v20 = vpop.eup %1905  ;;  %v2208_v24 = vsel %vm310_vm3, %v1904_v19, 0.0 }
 0x132   :  { %v2196_v21 = vsel %vm310_vm3, %v1906_v20, 0.0  ;;  %v2202_v23 = vpack.c.bf16 %v1904_v19, %v1906_v20 }
 0x133   :  { %352 = vadd.xlane.f32.xlu1 %v2196_v21  ;;  %350 = vadd.xlane.f32.xlu0 %v2200_v22 }
 0x137   :  { %354 = vadd.xlane.f32.xlu0 %v2208_v24 }
 0x1b3   :  { %v343_v27 = vpop.xlane.xlu1 %342 }
 0x1b4   :  { %v357_v28 = vadd.f32 %v343_v27, %v333_v25  ;;  %v341_v29 = vpop.xlane.xlu0 %340 }
 0x1b5   :  { %v356_v30 = vadd.f32 %v341_v29, %v332_v26 }
 0x1b6   :  { %366 = vst.msk [vmem:[#allocation3 + $0x8] sm:$0xff] %vm38_vm2, %v357_v28 }
 0x1b7   :  { %365 = vst.msk [vmem:[#allocation3] sm:$0xff] %vm38_vm2, %v356_v30 }
 0x1b8   :  { %v347_v32 = vpop.xlane.xlu0 %346 }
 0x1b9   :  { %v359_v33 = vadd.f32 %v347_v32, %v335_v31 }
 0x1bb   :  { %368 = vst.msk [vmem:[#allocation3 + $0x18] sm:$0xff] %vm38_vm2, %v359_v33 }
 0x1bc   :  { %v349_v36 = vpop.xlane.xlu1 %348  ;;  %v345_v37 = vpop.xlane.xlu0 %344 }
 0x1bd   :  { %v360_v38 = vadd.f32 %v349_v36, %v336_v34  ;;  %v358_v39 = vadd.f32 %v345_v37, %v334_v35  ;;  %v386_v40 = vld [vmem:[#allocation3 + $0x8] sm:$0xff] }
 0x1be   :  { %v394_v43 = vmul.f32 0.125, %v386_v40  ;;  %v385_v45 = vld [vmem:[#allocation3] sm:$0xff] }
 0x1bf   :  { %369 = vst.msk [vmem:[#allocation3 + $0x20] sm:$0xff] %vm38_vm2, %v360_v38  ;;  %367 = vst.msk [vmem:[#allocation3 + $0x10] sm:$0xff] %vm38_vm2, %v358_v39  ;;  %v393_v46 = vmul.f32 0.125, %v385_v45 }
 0x1c0   :  { %v353_v47 = vpop.xlane.xlu1 %352  ;;  %408 = vperm.xlu0 %1889, %v394_v43   ;;  %v351_v48 = vpop.xlane.xlu0 %350 }
 0x1c1   :  { %v362_v49 = vadd.f32 %v353_v47, %v338_v41  ;;  %v361_v50 = vadd.f32 %v351_v48, %v337_v44  ;;  %403 = vperm.xlu1 %1890, %v393_v46   ;;  %v2216_v52 = vpack.c.bf16 %v394_v43, %v393_v46 }
 0x1c2   :  { %v388_v54 = vld [vmem:[#allocation3 + $0x18] sm:$0xff] }
 0x1c3   :  { %371 = vst.msk [vmem:[#allocation3 + $0x30] sm:$0xff] %vm38_vm2, %v362_v49  ;;  %370 = vst.msk [vmem:[#allocation3 + $0x28] sm:$0xff] %vm38_vm2, %v361_v50  ;;  %v396_v55 = vmul.f32 0.125, %v388_v54 }
 0x1c4   :  { %v355_v56 = vpop.xlane.xlu0 %354 }
 0x1c5   :  { %v363_v57 = vadd.f32 %v355_v56, %v339_v53  ;;  %418 = vperm.xlu1 %1890, %v396_v55  }
 0x1c6   :  { %v389_v59 = vld [vmem:[#allocation3 + $0x20] sm:$0xff]  ;;  %v387_v60 = vld [vmem:[#allocation3 + $0x10] sm:$0xff] }
 0x1c7   :  { %372 = vst.msk [vmem:[#allocation3 + $0x38] sm:$0xff] %vm38_vm2, %v363_v57  ;;  %v397_v61 = vmul.f32 0.125, %v389_v59  ;;  %v395_v62 = vmul.f32 0.125, %v387_v60  ;;  %vm902_vm2 = vcmask 261120  }
 0x1c9   :  { %423 = vperm.xlu0 %1889, %v397_v61   ;;  %413 = vperm.xlu1 %1890, %v395_v62   ;;  %v2221_v63 = vpack.c.bf16 %v396_v55, %v395_v62  ;;  %v2256_v55 = vshrl.u32 %v305_v51, 7 }
 0x1ca   :  { %v391_v0 = vld [vmem:[#allocation3 + $0x30] sm:$0xff]  ;;  %v390_v1 = vld [vmem:[#allocation3 + $0x28] sm:$0xff] }
 0x1cb   :  { %v399_v2 = vmul.f32 0.125, %v391_v0  ;;  %v398_v3 = vmul.f32 0.125, %v390_v1  ;;  %v513_v60 = vadd.s32 8, %v2256_v55  ;;  %vm520_vm5 = vcmp.eq.s32.totalorder %v2256_v55, %v2160_v58 }
 0x1cd   :  { %433 = vperm.xlu0 %1889, %v399_v2   ;;  %428 = vperm.xlu1 %1890, %v398_v3   ;;  %v2223_v4 = vpack.c.bf16 %v398_v3, %v397_v61  ;;  %vm521_vm6 = vcmp.eq.s32.totalorder %v513_v60, %v2160_v58 }
 0x1ce   :  { %v392_v5 = vld [vmem:[#allocation3 + $0x38] sm:$0xff]  ;;  %vm2262_vm7 = vmpackc.low %vm521_vm6, %vm520_vm5 }
 0x1cf   :  { %v400_v6 = vmul.f32 0.125, %v392_v5 }
 0x1d1   :  { %438 = vperm.xlu1 %1890, %v400_v6   ;;  %v2225_v10 = vpack.c.bf16 %v400_v6, %v399_v2 }
 0x23f   :  { %v409_v11 = vpop.permute.xlu0 %408 }
 0x240   :  { %v442_v14 = vsub.f32 %v2165_v7, %v409_v11  ;;  %v404_v15 = vpop.permute.xlu1 %403 }
 0x241   :  { %v441_v19 = vsub.f32 %v2170_v8, %v404_v15 }
 0x242   :  { %v452_v20 = vsel %vm310_vm3, %v442_v14, 0.0 }
 0x243   :  { %v460_v25 = vmul.f32 %v452_v20, %v452_v20  ;;  %v451_v26 = vsel %vm310_vm3, %v441_v19, 0.0 }
 0x244   :  { %v419_v27 = vpop.permute.xlu1 %418  ;;  %v459_v28 = vmul.f32 %v451_v26, %v451_v26 }
 0x245   :  { %v444_v29 = vsub.f32 %v2177_v12, %v419_v27  ;;  %469 = vadd.xlane.f32.xlu1 %v460_v25  ;;  %v514_v27 = vadd.s32 16, %v2256_v55 }
 0x246   :  { %467 = vadd.xlane.f32.xlu0 %v459_v28 }
 0x247   :  { %v454_v30 = vsel %vm310_vm3, %v444_v29, 0.0  ;;  %v515_v29 = vadd.s32 24, %v2256_v55  ;;  %vm522_vm8 = vcmp.eq.s32.totalorder %v514_v27, %v2160_v58 }
 0x248   :  { %v414_v7 = vpop.permute.xlu1 %413  ;;  %v424_v31 = vpop.permute.xlu0 %423  ;;  %v462_v32 = vmul.f32 %v454_v30, %v454_v30 }
 0x249   :  { %v443_v8 = vsub.f32 %v2188_v17, %v414_v7  ;;  %v445_v33 = vsub.f32 %v2184_v16, %v424_v31  ;;  %vm523_vm9 = vcmp.eq.s32.totalorder %v515_v29, %v2160_v58  ;;  %v516_v7 = vadd.s32 32, %v2256_v55 }
 0x24a   :  { %473 = vadd.xlane.f32.xlu0 %v462_v32  ;;  %v517_v31 = vadd.s32 40, %v2256_v55  ;;  %vm2276_vm10 = vmpackc.low %vm523_vm9, %vm522_vm8 }
 0x24b   :  { %v453_v34 = vsel %vm310_vm3, %v443_v8, 0.0  ;;  %v455_v35 = vsel %vm310_vm3, %v445_v33, 0.0  ;;  %vm524_vm11 = vcmp.eq.s32.totalorder %v516_v7, %v2160_v58 }
 0x24c   :  { %v429_v12 = vpop.permute.xlu1 %428  ;;  %v434_v36 = vpop.permute.xlu0 %433  ;;  %v461_v37 = vmul.f32 %v453_v34, %v453_v34  ;;  %v463_v38 = vmul.f32 %v455_v35, %v455_v35  ;;  %v518_v34 = vadd.s32 48, %v2256_v55  ;;  %v519_v35 = vadd.s32 56, %v2256_v55 }
 0x24d   :  { %v446_v39 = vsub.f32 %v2200_v22, %v429_v12  ;;  %v447_v40 = vsub.f32 %v2196_v21, %v434_v36  ;;  %v507_v21 = vld [vmem:[%s2452_s3] sm:$0xff]  ;;  %vm525_vm12 = vcmp.eq.s32.totalorder %v517_v31, %v2160_v58 }
 0x24e   :  { %471 = vadd.xlane.f32.xlu0 %v461_v37  ;;  %475 = vadd.xlane.f32.xlu1 %v463_v38  ;;  %vm1796_vm13 = vmpackc.low %vm525_vm12, %vm524_vm11  ;;  %vm526_vm14 = vcmp.eq.s32.totalorder %v518_v34, %v2160_v58  ;;  %vm527_vm15 = vcmp.eq.s32.totalorder %v519_v35, %v2160_v58 }
 0x24f   :  { %v456_v16 = vsel %vm310_vm3, %v446_v39, 0.0  ;;  %v457_v17 = vsel %vm310_vm3, %v447_v40, 0.0  ;;  %1631 = vmatprep.mubr.msk.f32.mxu1 %vm536_vm4, %v507_v21  ;;  %vm1802_vm0 = vmpackc.low %vm527_vm15, %vm526_vm14 }
 0x250   :  { %v439_v41 = vpop.permute.xlu1 %438  ;;  %v464_v43 = vmul.f32 %v456_v16, %v456_v16  ;;  %v465_v44 = vmul.f32 %v457_v17, %v457_v17  ;;  %v508_v17 = vld [vmem:[%s2452_s3 + $0x8] sm:$0xff] }
 0x251   :  { %v448_v45 = vsub.f32 %v2208_v24, %v439_v41  ;;  %v509_v41 = vld [vmem:[%s2452_s3 + $0x10] sm:$0xff] }
 0x252   :  { %477 = vadd.xlane.f32.xlu0 %v464_v43  ;;  %479 = vadd.xlane.f32.xlu1 %v465_v44  ;;  %v510_v43 = vld [vmem:[%s2452_s3 + $0x18] sm:$0xff] }
 0x253   :  { %v458_v22 = vsel %vm310_vm3, %v448_v45, 0.0 }
 0x254   :  { %v466_v46 = vmul.f32 %v458_v22, %v458_v22 }
 0x256   :  { %481 = vadd.xlane.f32.xlu0 %v466_v46 }
 0x2d2   :  { %v470_v47 = vpop.xlane.xlu1 %469 }
 0x2d3   :  { %v484_v48 = vmul.f32 0.125, %v470_v47  ;;  %v468_v49 = vpop.xlane.xlu0 %467 }
 0x2d4   :  { %v483_v50 = vmul.f32 0.125, %v468_v49  ;;  %v637_v49 = vld [vmem:[%s2453_s4 + $0x18] sm:$0xff] }
 0x2d5   :  { %v492_v53 = vadd.f32 1e-05, %v484_v48 }
 0x2d6   :  { %v491_v24 = vadd.f32 1e-05, %v483_v50 }
 0x2d7   :  { %1907 = vrsqrt.f32 %v492_v53  ;;  %v474_v54 = vpop.xlane.xlu0 %473 }
 0x2d8   :  { %1909 = vrsqrt.f32 %v491_v24  ;;  %v486_v56 = vmul.f32 0.125, %v474_v54 }
 0x2da   :  { %v494_v61 = vadd.f32 1e-05, %v486_v56 }
 0x2db   :  { %v476_v57 = vpop.xlane.xlu1 %475  ;;  %v472_v59 = vpop.xlane.xlu0 %471 }
 0x2dc   :  { %v487_v62 = vmul.f32 0.125, %v476_v57  ;;  %v485_v0 = vmul.f32 0.125, %v472_v59  ;;  %1911 = vrsqrt.f32 %v494_v61 }
 0x2de   :  { %v493_v1 = vadd.f32 1e-05, %v485_v0  ;;  %v495_v51 = vadd.f32 1e-05, %v487_v62 }
 0x2df   :  { %v480_v2 = vpop.xlane.xlu1 %479  ;;  %v478_v3 = vpop.xlane.xlu0 %477 }
 0x2e0   :  { %v489_v5 = vmul.f32 0.125, %v480_v2  ;;  %v488_v6 = vmul.f32 0.125, %v478_v3  ;;  %1913 = vrsqrt.f32 %v493_v1 }
 0x2e1   :  { %v1908_v11 = vpop.eup %1907  ;;  %1915 = vrsqrt.f32 %v495_v51 }
 0x2e2   :  { %v1910_v14 = vpop.eup %1909  ;;  %v496_v15 = vadd.f32 1e-05, %v488_v6  ;;  %v497_v20 = vadd.f32 1e-05, %v489_v5 }
 0x2e3   :  { %v482_v25 = vpop.xlane.xlu0 %481  ;;  %v1783_v26 = vpack.c.bf16 %v1908_v11, %v1910_v14 }
 0x2e4   :  { %v490_v28 = vmul.f32 0.125, %v482_v25  ;;  %1917 = vrsqrt.f32 %v496_v15 }
 0x2e5   :  { %1785 = vmatprep.subr.msk.bf16.mxu1 %vm2262_vm7, %v1783_v26  ;;  %1919 = vrsqrt.f32 %v497_v20 }
 0x2e6   :  { %v498_v30 = vadd.f32 1e-05, %v490_v28  ;;  %1788 = vmatpush3.bf16.msk.msra.mxu1 %vm2262_vm7, %v1783_v26  ;;  %v1912_v32 = vpop.eup %1911 }
 0x2e8   :  { %1921 = vrsqrt.f32 %v498_v30 }
 0x2ea   :  { %v1914_v8 = vpop.eup %1913 }
 0x2eb   :  { %v1789_v12 = vpack.c.bf16 %v1912_v32, %v1914_v8  ;;  %v1916_v36 = vpop.eup %1915 }
 0x2ed   :  { %1791 = vmatprep.subr.msk.bf16.mxu1 %vm2276_vm10, %v1789_v12 }
 0x2ee   :  { %v1918_v37 = vpop.eup %1917  ;;  %1794 = vmatpush3.bf16.msk.msra.mxu1 %vm2276_vm10, %v1789_v12 }
 0x2ef   :  { %v1795_v38 = vpack.c.bf16 %v1918_v37, %v1916_v36  ;;  %v1920_v39 = vpop.eup %1919 }
 0x2f1   :  { %1797 = vmatprep.subr.msk.bf16.mxu1 %vm1796_vm13, %v1795_v38 }
 0x2f2   :  { %v1922_v40 = vpop.eup %1921  ;;  %1800 = vmatpush3.bf16.msk.msra.mxu1 %vm1796_vm13, %v1795_v38 }
 0x2f3   :  { %v1801_v16 = vpack.c.bf16 %v1922_v40, %v1920_v39 }
 0x2f5   :  { %1803 = vmatprep.subr.msk.bf16.mxu1 %vm1802_vm0, %v1801_v16 }
 0x2f6   :  { %1806 = vmatpush3.bf16.msk.msra.mxu1 %vm1802_vm0, %v1801_v16 }
 0x2f7   :  { %1808 = vmatprep.subr.bf16.mxu1 %v2216_v52 }
 0x2f9   :  { %1632 = vmatmul.mubr.msk.f32.vlgmr.msra.gmra.mrb[0].mxu1 %vm536_vm4, %v508_v17 }
 0x2fa   :  { %1810 = vmatpush3.bf16.msra.mxu1 %v2216_v52  ;;  %1634 = vmatprep.mubr.msk.f32.mxu1 %vm536_vm4, %v509_v41  ;;  %v896_v52 = vld [vmem:[%s2454_s5] sm:$0xff] }
 0x2fb   :  { %1812 = vmatprep.subr.bf16.mxu1 %v2221_v63 }
 0x2fd   :  { %1635 = vmatmul.mubr.msk.f32.gmra.mrb[2].mxu1 %vm536_vm4, %v510_v43 }
 0x2fe   :  { %1814 = vmatpush3.bf16.msra.mxu1 %v2221_v63 }
 0x2ff   :  { %1816 = vmatprep.subr.bf16.mxu1 %v2223_v4 }
 0x302   :  { %1818 = vmatpush3.bf16.msra.mxu1 %v2223_v4 }
 0x303   :  { %1820 = vmatprep.subr.bf16.mxu1 %v2225_v10 }
 0x306   :  { %1822 = vmatpush3.bf16.msra.mxu1 %v2225_v10 }
 0x307   :  { %1825 = vmatprep.subr.msk.bf16.mxu1 %vm2312_vm1, %v2172_v9 }
 0x3cc   :  { %v1633_v63 = vpop.f32.mrb[0].mxu1 }
 0x3cd   :  { %v615_v44 = vpop.f32.mrb[1].mxu1 }
 0x3ce   :  { %1653 = vmatprep.mubr.msk.f32.mxu1 %vm536_vm4, %v615_v44 }
 0x3cf   :  { %1654 = vmatmul.mubr.msk.f32.vlgmr.msra.gmra.mrb[4].mxu1 %vm536_vm4, %v1633_v63 }
 0x3d0   :  { %1828 = vmatpush3.bf16.msk.msra.mxu1 %vm2312_vm1, %v2172_v9  ;;  %v1636_v4 = vpop.f32.mrb[2].mxu1  ;;  %v635_v9 = vld [vmem:[%s2453_s4 + $0x8] sm:$0xff] }
 0x3d1   :  { %1831 = vmatprep.subr.msk.bf16.mxu1 %vm2312_vm1, %v2179_v13  ;;  %v625_v10 = vpop.f32.mrb[3].mxu1 }
 0x3d2   :  { %1656 = vmatprep.mubr.msk.f32.mxu1 %vm536_vm4, %v625_v10 }
 0x3d3   :  { %1657 = vmatmul.mubr.msk.f32.gmra.mrb[6].mxu1 %vm536_vm4, %v1636_v4 }
 0x3d4   :  { %1834 = vmatpush3.bf16.msk.msra.mxu1 %vm2312_vm1, %v2179_v13  ;;  %1675 = vmatprep.mubr.msk.f32.mxu1 %vm536_vm4, %v615_v44  ;;  %v634_v13 = vld [vmem:[%s2453_s4] sm:$0xff] }
 0x3d5   :  { %1837 = vmatprep.subr.msk.bf16.mxu1 %vm2312_vm1, %v2190_v18 }
 0x3d8   :  { %1840 = vmatpush3.bf16.msk.msra.mxu1 %vm2312_vm1, %v2190_v18 }
 0x3d9   :  { %1843 = vmatprep.subr.msk.bf16.mxu1 %vm2312_vm1, %v2202_v23 }
 0x3dc   :  { %1846 = vmatpush3.bf16.msk.msra.mxu1 %vm2312_vm1, %v2202_v23  ;;  %v636_v23 = vld [vmem:[%s2453_s4 + $0x10] sm:$0xff] }
 0x3df   :  { %1676 = vmatmul.mubr.msk.f32.vlgmr.msra.gmra.mrb[8].mxu1 %vm536_vm4, %v1633_v63 }
 0x3e0   :  { %1678 = vmatprep.mubr.msk.f32.mxu1 %vm536_vm4, %v625_v10 }
 0x3e3   :  { %1679 = vmatmul.mubr.msk.f32.gmra.mrb[10].mxu1 %vm536_vm4, %v1636_v4  ;;  %vm1950_vm4 = vmmov 0  }
 0x3e4   :  { %1689 = vmatprep.mubr.msk.f32.mxu1 %vm902_vm2, %v896_v52  ;;  %1725 = vmatprep.mubr.msk.f32.mxu0 %vm1950_vm4, %v1948_v42  ;;  %v1180_v52 = vld [vmem:[%s2456_s7] sm:$0x1] }
 0x4a2   :  { %v1655_v18 = vpop.f32.mrb[4].mxu1 }
 0x4a3   :  { %v736_v45 = vsub.f32 %v635_v9, %v1655_v18  ;;  %v716_v22 = vpop.f32.mrb[5].mxu1 }
 0x4a4   :  { %v735_v46 = vsub.f32 %v634_v13, %v716_v22 }
 0x4a5   :  { %746 = vperm.xlu0 %1889, %v736_v45  }
 0x4a6   :  { %741 = vperm.xlu1 %1890, %v735_v46   ;;  %v1658_v21 = vpop.f32.mrb[6].mxu1 }
 0x4a7   :  { %v726_v47 = vpop.f32.mrb[7].mxu1  ;;  %v738_v50 = vsub.f32 %v637_v49, %v1658_v21 }
 0x4a8   :  { %v737_v48 = vsub.f32 %v636_v23, %v726_v47 }
 0x4aa   :  { %751 = vperm.xlu1 %1890, %v737_v48  }
 0x4ae   :  { %756 = vperm.xlu1 %1890, %v738_v50  }
 0x4b2   :  { %v1677_v53 = vpop.f32.mrb[8].mxu1 }
 0x4b3   :  { %v825_v24 = vpop.f32.mrb[9].mxu1 }
 0x4b6   :  { %v1680_v54 = vpop.f32.mrb[10].mxu1 }
 0x4b7   :  { %v835_v56 = vpop.f32.mrb[11].mxu1 }
 0x524   :  { %v747_v57 = vpop.permute.xlu0 %746 }
 0x525   :  { %v831_v59 = vadd.f32 %v1677_v53, %v747_v57  ;;  %v742_v60 = vpop.permute.xlu1 %741 }
 0x526   :  { %v826_v61 = vadd.f32 %v825_v24, %v742_v60  ;;  %v985_v60 = vld [vmem:[%s2455_s6 + $0x8] sm:$0xff] }
 0x527   :  { %1923 = vtanh.f32 %v831_v59 }
 0x528   :  { %1925 = vtanh.f32 %v826_v61  ;;  %v984_v61 = vld [vmem:[%s2455_s6] sm:$0xff] }
 0x529   :  { %v752_v62 = vpop.permute.xlu1 %751 }
 0x52a   :  { %v836_v0 = vadd.f32 %v835_v56, %v752_v62 }
 0x52c   :  { %1927 = vtanh.f32 %v836_v0 }
 0x52d   :  { %v757_v1 = vpop.permute.xlu1 %756 }
 0x52e   :  { %v841_v2 = vadd.f32 %v1680_v54, %v757_v1  ;;  %v897_v54 = vld [vmem:[%s2454_s5 + $0x8] sm:$0xff] }
 0x530   :  { %1929 = vtanh.f32 %v841_v2 }
 0x531   :  { %v2361_v3 = vpop.eup %1923 }
 0x532   :  { %v2363_v51 = vpop.eup %1925  ;;  %v849_v5 = vsel %vm310_vm3, %v2361_v3, 0.0 }
 0x533   :  { %854 = vadd.xlane.f32.xlu1 %v849_v5  ;;  %v848_v6 = vsel %vm310_vm3, %v2363_v51, 0.0  ;;  %v1867_v56 = vpack.c.bf16 %v2361_v3, %v2363_v51 }
 0x534   :  { %852 = vadd.xlane.f32.xlu0 %v848_v6 }
 0x536   :  { %v2371_v11 = vpop.eup %1927 }
 0x537   :  { %v850_v14 = vsel %vm310_vm3, %v2371_v11, 0.0 }
 0x538   :  { %856 = vadd.xlane.f32.xlu0 %v850_v14 }
 0x53a   :  { %v2376_v15 = vpop.eup %1929 }
 0x53b   :  { %v851_v20 = vsel %vm310_vm3, %v2376_v15, 0.0  ;;  %v1871_v33 = vpack.c.bf16 %v2376_v15, %v2371_v11 }
 0x53c   :  { %858 = vadd.xlane.f32.xlu0 %v851_v20 }
 0x5c0   :  { %v855_v25 = vpop.xlane.xlu1 %854 }
 0x5c1   :  { %v861_v26 = vmul.f32 0.125, %v855_v25  ;;  %v853_v27 = vpop.xlane.xlu0 %852 }
 0x5c2   :  { %v860_v28 = vmul.f32 0.125, %v853_v27  ;;  %v1949_v27 = vmov 0.0|0.0  }
 0x5c3   :  { %v865_v29 = vsub.f32 %v2361_v3, %v861_v26  ;;  %1879 = vmatprep.subr.bf16.mxu0 %v1949_v27 }
 0x5c4   :  { %v864_v30 = vsub.f32 %v2363_v51, %v860_v28  ;;  %v1859_v7 = vpack.c.bf16 %v861_v26, %v860_v28 }
 0x5c5   :  { %v857_v31 = vpop.xlane.xlu0 %856  ;;  %v869_v32 = vsel %vm310_vm3, %v865_v29, 0.0 }
 0x5c6   :  { %v862_v8 = vmul.f32 0.125, %v857_v31  ;;  %v873_v34 = vmul.f32 %v869_v32, %v869_v32  ;;  %v868_v35 = vsel %vm310_vm3, %v864_v30, 0.0 }
 0x5c7   :  { %v872_v12 = vmul.f32 %v868_v35, %v868_v35 }
 0x5c8   :  { %v866_v36 = vsub.f32 %v2371_v11, %v862_v8  ;;  %878 = vadd.xlane.f32.xlu0 %v873_v34 }
 0x5c9   :  { %876 = vadd.xlane.f32.xlu1 %v872_v12  ;;  %v859_v37 = vpop.xlane.xlu0 %858 }
 0x5ca   :  { %v863_v38 = vmul.f32 0.125, %v859_v37  ;;  %v870_v39 = vsel %vm310_vm3, %v866_v36, 0.0 }
 0x5cb   :  { %v874_v40 = vmul.f32 %v870_v39, %v870_v39 }
 0x5cc   :  { %v867_v16 = vsub.f32 %v2376_v15, %v863_v38  ;;  %v1863_v17 = vpack.c.bf16 %v863_v38, %v862_v8 }
 0x5cd   :  { %880 = vadd.xlane.f32.xlu1 %v874_v40 }
 0x5ce   :  { %v871_v41 = vsel %vm310_vm3, %v867_v16, 0.0 }
 0x5cf   :  { %v875_v43 = vmul.f32 %v871_v41, %v871_v41 }
 0x5d1   :  { %882 = vadd.xlane.f32.xlu0 %v875_v43 }
 0x655   :  { %v879_v63 = vpop.xlane.xlu0 %878 }
 0x656   :  { %v885_v44 = vmul.f32 0.125, %v879_v63  ;;  %v877_v4 = vpop.xlane.xlu1 %876 }
 0x657   :  { %v884_v10 = vmul.f32 0.125, %v877_v4 }
 0x658   :  { %v889_v9 = vadd.f32 1e-05, %v885_v44  ;;  %v14_v44 = vstv %s2457_s8 }
 0x659   :  { %v888_v13 = vadd.f32 1e-05, %v884_v10  ;;  %15 = vst [vmem:[#allocation4] sm:$0x1] %v14_v44 }
 0x65a   :  { %1931 = vrsqrt.f32 %v889_v9  ;;  %v881_v18 = vpop.xlane.xlu1 %880 }
 0x65b   :  { %1933 = vrsqrt.f32 %v888_v13  ;;  %v886_v45 = vmul.f32 0.125, %v881_v18 }
 0x65d   :  { %v890_v22 = vadd.f32 1e-05, %v886_v45 }
 0x65e   :  { %v883_v46 = vpop.xlane.xlu0 %882 }
 0x65f   :  { %v887_v23 = vmul.f32 0.125, %v883_v46  ;;  %1935 = vrsqrt.f32 %v890_v22  ;;  %v1339_v46 = vsub.s32 0, %v2256_v55 }
 0x660   :  { %v1257_v10 = vld [vmem:[#allocation4] sm:$0x1] }
 0x661   :  { %v891_v21 = vadd.f32 1e-05, %v887_v23 }
 0x663   :  { %1937 = vrsqrt.f32 %v891_v21 }
 0x664   :  { %v1932_v47 = vpop.eup %1931 }
 0x665   :  { %v1934_v48 = vpop.eup %1933 }
 0x666   :  { %v1847_v49 = vpack.c.bf16 %v1932_v47, %v1934_v48 }
 0x668   :  { %1849 = vmatprep.subr.msk.bf16.mxu1 %vm2262_vm7, %v1847_v49 }
 0x669   :  { %1852 = vmatpush3.bf16.msk.msra.mxu1 %vm2262_vm7, %v1847_v49  ;;  %v1936_v50 = vpop.eup %1935 }
 0x66d   :  { %v1938_v53 = vpop.eup %1937 }
 0x66e   :  { %v1853_v24 = vpack.c.bf16 %v1938_v53, %v1936_v50 }
 0x670   :  { %1855 = vmatprep.subr.msk.bf16.mxu1 %vm2276_vm10, %v1853_v24 }
 0x671   :  { %1858 = vmatpush3.bf16.msk.msra.mxu1 %vm2276_vm10, %v1853_v24 }
 0x672   :  { %1860 = vmatprep.subr.bf16.mxu1 %v1859_v7 }
 0x674   :  { %1690 = vmatmul.mubr.msk.f32.vlgmr.msra.gmra.mrb[12].mxu1 %vm902_vm2, %v897_v54 }
 0x675   :  { %1862 = vmatpush3.bf16.msra.mxu1 %v1859_v7 }
 0x676   :  { %1864 = vmatprep.subr.bf16.mxu1 %v1863_v17 }
 0x679   :  { %1866 = vmatpush3.bf16.msra.mxu1 %v1863_v17 }
 0x67a   :  { %1868 = vmatprep.subr.bf16.mxu1 %v1867_v56 }
 0x747   :  { %v1691_v57 = vpop.f32.mrb[12].mxu1 }
 0x748   :  { %v975_v59 = vpop.f32.mrb[13].mxu1 }
 0x749   :  { %1700 = vmatprep.mubr.msk.f32.mxu1 %vm902_vm2, %v975_v59 }
 0x74a   :  { %1701 = vmatmul.mubr.msk.f32.vlgmr.msra.gmra.mrb[14].mxu1 %vm902_vm2, %v1691_v57 }
 0x74b   :  { %1870 = vmatpush3.bf16.msra.mxu1 %v1867_v56  ;;  %1711 = vmatprep.mubr.msk.f32.mxu1 %vm902_vm2, %v975_v59 }
 0x74c   :  { %1872 = vmatprep.subr.bf16.mxu1 %v1871_v33 }
 0x74f   :  { %1874 = vmatpush3.bf16.msra.mxu1 %v1871_v33 }
 0x750   :  { %1875 = vmatprep.subr.bf16.mxu1 %v1949_v27 }
 0x752   :  { %1712 = vmatmul.mubr.msk.f32.vlgmr.msra.gmra.mrb[16].mxu1 %vm902_vm2, %v1691_v57 }
 0x753   :  { %1718 = vmatprep.mubr.msk.f32.mxu1 %vm1950_vm4, %v1948_v42 }
 0x81d   :  { %v1702_v62 = vpop.f32.mrb[14].mxu1 }
 0x81e   :  { %v1068_v0 = vsub.f32 %v985_v60, %v1702_v62  ;;  %v1058_v1 = vpop.f32.mrb[15].mxu1 }
 0x81f   :  { %v1067_v2 = vsub.f32 %v984_v61, %v1058_v1 }
 0x820   :  { %1076 = vperm.xlu0 %1889, %v1068_v0  }
 0x821   :  { %1071 = vperm.xlu1 %1890, %v1067_v2  }
 0x825   :  { %v1713_v3 = vpop.f32.mrb[16].mxu1 }
 0x826   :  { %v1145_v51 = vpop.f32.mrb[17].mxu1 }
 0x89f   :  { %v1077_v5 = vpop.permute.xlu0 %1076 }
 0x8a0   :  { %v1151_v6 = vadd.f32 %v1713_v3, %v1077_v5  ;;  %v1072_v11 = vpop.permute.xlu1 %1071 }
 0x8a1   :  { %v1146_v14 = vadd.f32 %v1145_v51, %v1072_v11 }
 0x8a2   :  { %1939 = vtanh.f32 %v1151_v6 }
 0x8a3   :  { %1941 = vtanh.f32 %v1146_v14 }
 0x8ac   :  { %v1940_v15 = vpop.eup %1939 }
 0x8ad   :  { %v1942_v20 = vpop.eup %1941  ;;  %v1157_v25 = vsel %vm310_vm3, %v1940_v15, 0.0 }
 0x8ae   :  { %1160 = vadd.xlane.f32.xlu0 %v1157_v25  ;;  %v1156_v26 = vsel %vm310_vm3, %v1942_v20, 0.0  ;;  %v1883_v63 = vpack.c.bf16 %v1940_v15, %v1942_v20 }
 0x8af   :  { %1158 = vadd.xlane.f32.xlu1 %v1156_v26 }
 0x93b   :  { %v1161_v28 = vpop.xlane.xlu0 %1160 }
 0x93c   :  { %v1163_v29 = vmul.f32 0.125, %v1161_v28  ;;  %v1159_v30 = vpop.xlane.xlu1 %1158 }
 0x93d   :  { %v1162_v7 = vmul.f32 0.125, %v1159_v30 }
 0x93e   :  { %v1165_v31 = vsub.f32 %v1940_v15, %v1163_v29 }
 0x93f   :  { %v1164_v32 = vsub.f32 %v1942_v20, %v1162_v7  ;;  %v1880_v8 = vpack.c.bf16 %v1163_v29, %v1162_v7 }
 0x940   :  { %v1167_v34 = vsel %vm310_vm3, %v1165_v31, 0.0 }
 0x941   :  { %1881 = vmatpush3.bf16.msra.mxu0 %v1880_v8  ;;  %v1169_v35 = vmul.f32 %v1167_v34, %v1167_v34  ;;  %v1166_v12 = vsel %vm310_vm3, %v1164_v32, 0.0  ;;  %vm1183_vm3 = vcmask 130048  }
 0x942   :  { %v1168_v36 = vmul.f32 %v1166_v12, %v1166_v12 }
 0x943   :  { %1172 = vadd.xlane.f32.xlu0 %v1169_v35 }
 0x944   :  { %1170 = vadd.xlane.f32.xlu1 %v1168_v36 }
 0x9d0   :  { %v1173_v37 = vpop.xlane.xlu0 %1172 }
 0x9d1   :  { %v1175_v38 = vmul.f32 0.125, %v1173_v37  ;;  %v1171_v39 = vpop.xlane.xlu1 %1170 }
 0x9d2   :  { %v1174_v40 = vmul.f32 0.125, %v1171_v39 }
 0x9d3   :  { %v1177_v16 = vadd.f32 1e-05, %v1175_v38 }
 0x9d4   :  { %v1176_v17 = vadd.f32 1e-05, %v1174_v40 }
 0x9d5   :  { %1943 = vrsqrt.f32 %v1177_v16 }
 0x9d6   :  { %1945 = vrsqrt.f32 %v1176_v17 }
 0x9df   :  { %v1944_v58 = vpop.eup %1943 }
 0x9e0   :  { %v1946_v41 = vpop.eup %1945 }
 0x9e1   :  { %v1876_v43 = vpack.c.bf16 %v1944_v58, %v1946_v41 }
 0x9e3   :  { %1878 = vmatpush3.bf16.msk.msra.mxu1 %vm2262_vm7, %v1876_v43 }
 0x9e4   :  { %1882 = vmatprep.subr.bf16.mxu1 %v1949_v27 }
 0x9e6   :  { %1719 = vmatmul.mubr.msk.f32.vlgmr.msra.gmra.mrb[18].mxu1 %vm1183_vm3, %v1180_v52 }
 0x9e7   :  { %1884 = vmatpush3.bf16.msra.mxu1 %v1883_v63  ;;  %1732 = vmatprep.mubr.msk.f32.mxu1 %vm1950_vm4, %v1948_v42 }
 0xab9   :  { %v1253_v4 = vpop.f32.mrb[18].mxu1 }
 0xaba   :  { %v1720_v19 = vpop.f32.mrb[19].mxu1  ;;  %1726 = vmatmul.mubr.msk.f32.vlgmr.msra.gmra.mrb[8].mxu0 %vm1183_vm3, %v1253_v4  ;;  %1733 = vmatmul.mubr.msk.f32.vlgmr.msra.gmra.mrb[20].mxu1 %vm1183_vm3, %v1253_v4 }
 0xb8d   :  { %v1327_v9 = vpop.f32.mrb[8].mxu0  ;;  %v1407_v13 = vpop.f32.mrb[20].mxu1 }
 0xb8e   :  { %v1331_v18 = vsub.f32 %v1257_v10, %v1327_v9  ;;  %v1727_v45 = vpop.f32.mrb[9].mxu0  ;;  %v1734_v22 = vpop.f32.mrb[21].mxu1 }
 0xb90   :  { %1334 = vperm.xlu1 %1890, %v1331_v18  }
 0xc0f   :  { %v1335_v23 = vpop.permute.xlu1 %1334 }
 0xc10   :  { %v1340_v42 = vrot.slane %v1335_v23, %v1339_v46 }
 0xc12   :  { %v1408_v21 = vadd.f32 %v1407_v13, %v1340_v42 }
 0xc14   :  { %1411 = vst [vmem:[%s2458_s9] sm:$0x1] %v1408_v21 }

</bundles_post_ra>
